<compile_context>
chip_gen: v5e
topology: v5e:2x2
jax: 0.10.0
libtpu: 0.0.40
codegen_flags: <defaults>
</compile_context>

<pallas_src>
import math
from functools import partial

import jax
import jax.numpy as jnp
from jax import lax
from jax.experimental import pallas as pl
from jax.experimental.pallas import tpu as pltpu


def _round_up(x, m):
    return ((x + m - 1) // m) * m


def _row_norm(x, scale, offset):
    # x: (tn, d) f32 ; scale/offset: (1, d); biased variance + 1e-9, like the module.
    mean = jnp.mean(x, axis=1, keepdims=True)
    var = jnp.mean((x - mean) ** 2, axis=1, keepdims=True) + 1e-9
    return (x - mean) * scale * lax.rsqrt(var) + offset


# ----------------------------------------------------------------------------
# small tiled matmul kernel for the reassociated order-1 pre-transform
#   y1 = feat @ W1
# ----------------------------------------------------------------------------
def _linear_kernel(x_ref, w_ref, y_ref):
    y_ref[...] = jnp.dot(x_ref[...], w_ref[...],
                         preferred_element_type=jnp.float32)


def _pallas_matmul(x, w, tile_m):
    M, D = x.shape
    Do = w.shape[1]
    assert M % tile_m == 0
    return pl.pallas_call(
        _linear_kernel,
        out_shape=jax.ShapeDtypeStruct((M, Do), jnp.float32),
        grid_spec=pltpu.PrefetchScalarGridSpec(
            num_scalar_prefetch=0,
            grid=(M // tile_m,),
            in_specs=[pl.BlockSpec((tile_m, D), lambda i: (i, 0)),
                      pl.BlockSpec((D, Do), lambda i: (0, 0))],
            out_specs=pl.BlockSpec((tile_m, Do), lambda i: (i, 0))),
        compiler_params=pltpu.CompilerParams(
            dimension_semantics=("parallel",)),
    )(x, w)


# ----------------------------------------------------------------------------
# fused aggregator kernel
#   hop0 = relu(feat_tile @ W0 + b0)            -> row-norm -> out[:, :D0]
#   hop1 = relu((sum_k adj_tile_k @ y1_k) + b1) -> row-norm -> out[:, D0:D0+D1]
# ----------------------------------------------------------------------------
def aggregator_kernel(feat_row_ref, adj_ref, y1_ref,
                      w0_ref, b0_ref, s0_ref, o0_ref,
                      b1_ref, s1_ref, o1_ref,
                      out_ref, acc_ref, *, d0, d1, dout):
    k = pl.program_id(1)
    nk = pl.num_programs(1)

    @pl.when(k == 0)
    def _init():
        acc_ref[...] = jnp.zeros_like(acc_ref)

    # partial spmm contribution: (tile_n, tile_k) @ (tile_k, d1), f32 accumulate
    acc_ref[...] += jnp.dot(adj_ref[...], y1_ref[...],
                            preferred_element_type=jnp.float32)

    @pl.when(k == nk - 1)
    def _finalize():
        # ---- order 0: identity hop ----
        z0 = jnp.dot(feat_row_ref[...], w0_ref[...],
                     preferred_element_type=jnp.float32) + b0_ref[...]
        p0 = _row_norm(jnp.maximum(z0, 0.0), s0_ref[...], o0_ref[...])

        # ---- order 1: accumulated adj @ (feat @ W1), then bias/act/norm ----
        z1 = acc_ref[...] + b1_ref[...]
        p1 = _row_norm(jnp.maximum(z1, 0.0), s1_ref[...], o1_ref[...])

        # ---- aggr == 'concat', written as direct lane slabs (no concatenate) ----
        out_ref[:, :d0] = p0
        out_ref[:, d0:d0 + d1] = p1
        if dout > d0 + d1:  # static pad columns (sliced off in the wrapper)
            out_ref[:, d0 + d1:] = jnp.zeros(
                (out_ref.shape[0], dout - d0 - d1), jnp.float32)


def pruned_high_order_aggregator(adj, feat, params, *,
                                 tile_n=256, tile_k=512,
                                 pad_out_lanes=True, spmm_dtype=None):
    """Forward pass (non-first-layer path, dropout=0).
    Returns concat([trans0(feat), trans1(adj @ feat)], axis=1)."""
    (w0, b0, s0, o0), (w1, b1, s1, o1) = params
    N, D = feat.shape
    D0 = w0.shape[1]
    D1 = w1.shape[1]

    # ---- tile sizing (tunable; clamp for small graphs, keep tile_k | tile_n-aligned)
    tile_n = int(min(tile_n, N))
    tile_k = int(min(tile_k, N))
    if tile_k % tile_n:
        tile_k = max((tile_k // tile_n) * tile_n, tile_n)
    Np = _round_up(N, tile_k)          # multiple of tile_k (hence of tile_n)

    # ---- pad node dimension (zero rows/cols are harmless: spmm adds 0, padded
    #      rows are sliced off; var=0 rows stay finite thanks to the 1e-9 term)
    if Np > N:
        adj_p = jnp.pad(adj, ((0, Np - N), (0, Np - N)))
        feat_p = jnp.pad(feat, ((0, Np - N), (0, 0)))
    else:
        adj_p, feat_p = adj, feat

    # ---- reassociated order-1 pre-transform: y1 = feat @ W1  (Pallas matmul)
    y1 = _pallas_matmul(feat_p, w1, tile_m=tile_k)

    # optional bf16 operands for the N^2 spmm stream (v6e/v7x); f32 accumulation
    if spmm_dtype is not None:
        adj_p = adj_p.astype(spmm_dtype)
        y1 = y1.astype(spmm_dtype)

    Dout = D0 + D1
    Dout_p = _round_up(Dout, 128) if pad_out_lanes else Dout

    grid = (Np // tile_n, Np // tile_k)
    const2 = lambda shape: pl.BlockSpec(shape, lambda i, k: (0, 0))

    flops = 2 * Np * Np * D1 + 2 * Np * D * D0 + 2 * Np * D * D1
    bytes_accessed = 4 * (Np * Np + Np * D + Np * D1 + Np * Dout_p)
    cost = pl.CostEstimate(flops=flops, transcendentals=2 * Np,
                           bytes_accessed=bytes_accessed)

    out = pl.pallas_call(
        partial(aggregator_kernel, d0=D0, d1=D1, dout=Dout_p),
        out_shape=jax.ShapeDtypeStruct((Np, Dout_p), jnp.float32),
        grid_spec=pltpu.PrefetchScalarGridSpec(
            num_scalar_prefetch=0,
            grid=grid,
            in_specs=[
                pl.BlockSpec((tile_n, D), lambda i, k: (i, 0)),       # feat row tile (hop0)
                pl.BlockSpec((tile_n, tile_k), lambda i, k: (i, k)),  # adj (row, col) tile
                pl.BlockSpec((tile_k, D1), lambda i, k: (k, 0)),      # y1 col-block stream
                const2((D, D0)), const2((1, D0)),
                const2((1, D0)), const2((1, D0)),
                const2((1, D1)), const2((1, D1)), const2((1, D1)),
            ],
            out_specs=pl.BlockSpec((tile_n, Dout_p), lambda i, k: (i, 0)),
            scratch_shapes=[pltpu.VMEM((tile_n, D1), jnp.float32)],
        ),
        compiler_params=pltpu.CompilerParams(
            dimension_semantics=("parallel", "arbitrary"),
            vmem_limit_bytes=64 * 1024 * 1024),
        cost_estimate=cost,
    )(feat_p, adj_p, y1, w0, b0, s0, o0, b1, s1, o1)

    return out[:N, :Dout]


# ----------------------------------------------------------------------------
# reference + test
# ----------------------------------------------------------------------------
def _reference(adj, feat, params):
    outs = []
    hop = feat
    for o, (w, b, s, off) in enumerate(params):
        if o > 0:
            hop = adj @ hop
        z = jnp.maximum(hop @ w + b, 0.0)
        mean = jnp.mean(z, axis=1, keepdims=True)
        var = jnp.mean((z - mean) ** 2, axis=1, keepdims=True) + 1e-9
        outs.append((z - mean) * s * lax.rsqrt(var) + off)
    return jnp.concatenate(outs, axis=1)


def _xavier_uniform(key, fan_in, fan_out):
    bound = (6.0 / (fan_in + fan_out)) ** 0.5
    return jax.random.uniform(key, (fan_in, fan_out), jnp.float32, -bound, bound)


if __name__ == "__main__":
    # Small shapes: N=64 nodes, dim_in=[32, 32], dim_out=[32, 32], order=1.
    key = jax.random.PRNGKey(0)
    k_adj, k_feat, k_w0, k_w1 = jax.random.split(key, 4)

    N, D = 64, 32
    D0, D1 = 32, 32

    # Dense (row-normalized) adjacency standing in for the sparse adj_norm.
    adj_raw = jax.random.uniform(k_adj, (N, N), jnp.float32)
    adj = adj_raw / jnp.sum(adj_raw, axis=1, keepdims=True)

    feat = jax.random.normal(k_feat, (N, D), jnp.float32)

    # Deterministic parameter init (xavier_uniform weights pre-transposed to
    # (dim_in, dim_out), zeros bias/offset, ones scale), matching __init__.
    params = (
        (_xavier_uniform(k_w0, D, D0),
         jnp.zeros((1, D0), jnp.float32),
         jnp.ones((1, D0), jnp.float32),
         jnp.zeros((1, D0), jnp.float32)),
        (_xavier_uniform(k_w1, D, D1),
         jnp.zeros((1, D1), jnp.float32),
         jnp.ones((1, D1), jnp.float32),
         jnp.zeros((1, D1), jnp.float32)),
    )

    out = pruned_high_order_aggregator(adj, feat, params)
    out = jax.block_until_ready(out)

    ref = _reference(adj, feat, params)
    assert out.shape == (N, D0 + D1)
    assert jnp.allclose(out, ref, atol=1e-4, rtol=1e-4)

    # TODO(synk): dropout (p=0.0 here) and the first_layer column-mask gather
    # path are identity / omitted; true sparse adjacency would use scalar-prefetch
    # block indices to skip empty column blocks instead of the dense stand-in.
    print("KERNEL_OK")
</pallas_src>

<mosaic_0001>
module attributes {stable_mosaic.version = 11 : i64} {
  func.func @_linear_kernel(%arg0: i32, %arg1: memref<64x32xf32, #tpu.memory_space<vmem>>, %arg2: memref<32x32xf32, #tpu.memory_space<vmem>>, %arg3: memref<64x32xf32, #tpu.memory_space<vmem>>) attributes {dimension_semantics = [#tpu.dimension_semantics<parallel>], iteration_bounds = array<i64: 1>, scalar_prefetch = 0 : i64, scratch_operands = 0 : i64, tpu.core_type = #tpu.core_type<tc>, window_params = [{transform_indices = @transform_0, window_bounds = array<i64: 64, 32>}, {pipeline_mode = #tpu.pipeline_mode<synchronous>, transform_indices = @transform_1, window_bounds = array<i64: 32, 32>}, {transform_indices = @transform_2, window_bounds = array<i64: 64, 32>}]} {
    %c0 = arith.constant 0 : index
    %c0_0 = arith.constant 0 : index
    %0 = vector.load %arg1[%c0, %c0_0] : memref<64x32xf32, #tpu.memory_space<vmem>>, vector<64x32xf32>
    %c0_1 = arith.constant 0 : index
    %c0_2 = arith.constant 0 : index
    %1 = vector.load %arg2[%c0_1, %c0_2] : memref<32x32xf32, #tpu.memory_space<vmem>>, vector<32x32xf32>
    %cst = arith.constant dense<0.000000e+00> : vector<64x32xf32>
    %2 = tpu.matmul %0, %1, %cst {dimension_numbers = #tpu.dot_dimension_numbers<[1], [0], [0], [1], [0, 0, 1, 1], [], []>} : vector<64x32xf32>, vector<32x32xf32>, vector<64x32xf32> -> vector<64x32xf32>
    %c0_3 = arith.constant 0 : index
    %c0_4 = arith.constant 0 : index
    %3 = vector.load %arg3[%c0_3, %c0_4] : memref<64x32xf32, #tpu.memory_space<vmem>>, vector<64x32xf32>
    tpu.vector_store %arg3[%c0_3, %c0_4], %2 {strides = array<i32>} : memref<64x32xf32, #tpu.memory_space<vmem>>, vector<64x32xf32>,
    return
  }
  func.func @transform_0(%arg0: i32) -> (i32, i32) {
    %c0_i32 = arith.constant 0 : i32
    %c0_i32_0 = arith.constant 0 : i32
    return %arg0, %c0_i32 : i32, i32
  }
  func.func @transform_1(%arg0: i32) -> (i32, i32) {
    %c0_i32 = arith.constant 0 : i32
    %c0_i32_0 = arith.constant 0 : i32
    %c0_i32_1 = arith.constant 0 : i32
    return %c0_i32, %c0_i32_0 : i32, i32
  }
  func.func @transform_2(%arg0: i32) -> (i32, i32) {
    %c0_i32 = arith.constant 0 : i32
    %c0_i32_0 = arith.constant 0 : i32
    return %arg0, %c0_i32 : i32, i32
  }
}

</mosaic_0001>

<bundles_post_ra>
// kernel: tpu_custom_call.1
= control target key start
LH: loop header
LB: loop body
LE: loop exit
PB: predicated region body
PF: predicated region fallthrough
CT: control target
= control target key end

     0   :  { %vm23_vm0 = vcmask 261120   ;;  %s212_s1 = inlined_call_operand.vmem [shape: f32[32,32], index: 1, kind: input, shape index: {}]   ;;  %s213_s0 = inlined_call_operand.vmem [shape: f32[64,32], index: 0, kind: input, shape index: {}]   ;;  %s214_s2 = inlined_call_operand.vmem [shape: f32[64,32], index: 2, kind: output, shape index: {}]  }
   0x1   :  { %v22_v0 = vld [vmem:[%s212_s1 + $0x18] sm:$0xff]  ;;  %v21_v1 = vld [vmem:[%s212_s1 + $0x10] sm:$0xff]  ;;  %v20_v2 = vld [vmem:[%s212_s1 + $0x8] sm:$0xff] }
   0x2   :  { %110 = vmatpush.msra.mxu2 %v22_v0  ;;  %111 = vmatpush.msra.mxu3 %v22_v0  ;;  %v19_v3 = vld [vmem:[%s212_s1] sm:$0xff]  ;;  %v17_v5 = vld [vmem:[%s213_s0 + $0x30] sm:$0xff]  ;;  %v16_v8 = vld [vmem:[%s213_s0 + $0x28] sm:$0xff] }
   0x3   :  { %60 = vmatpush.msra.mxu0 %v22_v0  ;;  %109 = vmatpush.msra.mxu1 %v22_v0  ;;  %v15_v4 = vld [vmem:[%s213_s0 + $0x20] sm:$0xff]  ;;  %v13_v7 = vld [vmem:[%s213_s0 + $0x10] sm:$0xff]  ;;  %v18_v9 = vld [vmem:[%s213_s0 + $0x38] sm:$0xff] }
   0x4   :  { %113 = vmatpush.msra.mxu2 %v21_v1  ;;  %114 = vmatpush.msra.mxu3 %v21_v1  ;;  %v11_v6 = vld [vmem:[%s213_s0] sm:$0xff]  ;;  %v12_v10 = vld [vmem:[%s213_s0 + $0x8] sm:$0xff]  ;;  %v14_v11 = vld [vmem:[%s213_s0 + $0x18] sm:$0xff] }
   0x5   :  { %61 = vmatpush.msra.mxu0 %v21_v1  ;;  %112 = vmatpush.msra.mxu1 %v21_v1 }
   0x6   :  { %116 = vmatpush.msra.mxu2 %v20_v2  ;;  %117 = vmatpush.msra.mxu3 %v20_v2 }
   0x7   :  { %62 = vmatpush.msra.mxu0 %v20_v2  ;;  %115 = vmatpush.msra.mxu1 %v20_v2 }
   0x8   :  { %119 = vmatpush.msra.mxu2 %v19_v3  ;;  %120 = vmatpush.msra.mxu3 %v19_v3 }
   0x9   :  { %105 = vmatmul.msk.f32.vlgmr.msra.gmra.mxu2 %vm23_vm0, %v15_v4  ;;  %107 = vmatmul.msk.f32.vlgmr.msra.gmra.mxu3 %vm23_vm0, %v17_v5 }
   0xa   :  { %63 = vmatpush.msra.mxu0 %v19_v3  ;;  %118 = vmatpush.msra.mxu1 %v19_v3 }
   0xb   :  { %101 = vmatmul.msk.f32.vlgmr.msra.gmra.mxu0 %vm23_vm0, %v11_v6  ;;  %103 = vmatmul.msk.f32.vlgmr.msra.gmra.mxu1 %vm23_vm0, %v13_v7 }
  0x11   :  { %106 = vmatmul.msk.f32.gmra.mxu2 %vm23_vm0, %v16_v8  ;;  %108 = vmatmul.msk.f32.gmra.mxu3 %vm23_vm0, %v18_v9 }
  0x13   :  { %102 = vmatmul.msk.f32.gmra.mxu0 %vm23_vm0, %v12_v10  ;;  %104 = vmatmul.msk.f32.gmra.mxu1 %vm23_vm0, %v14_v11 }
  0x88   :  { %v65_v12 = vpop.f32.mrf.mxu0  ;;  %v71_v13 = vpop.f32.mrf.mxu1 }
  0x89   :  { %89 = vst.msk [vmem:[%s214_s2] sm:$0xff] %vm23_vm0, %v65_v12 }
  0x8a   :  { %91 = vst.msk [vmem:[%s214_s2 + $0x10] sm:$0xff] %vm23_vm0, %v71_v13 }
  0x8c   :  { %v77_v14 = vpop.f32.mrf.mxu2  ;;  %v83_v15 = vpop.f32.mrf.mxu3 }
  0x8d   :  { %93 = vst.msk [vmem:[%s214_s2 + $0x20] sm:$0xff] %vm23_vm0, %v77_v14 }
  0x8e   :  { %95 = vst.msk [vmem:[%s214_s2 + $0x30] sm:$0xff] %vm23_vm0, %v83_v15 }
  0x90   :  { %v68_v16 = vpop.f32.mrf.mxu0  ;;  %v74_v17 = vpop.f32.mrf.mxu1 }
  0x91   :  { %90 = vst.msk [vmem:[%s214_s2 + $0x8] sm:$0xff] %vm23_vm0, %v68_v16 }
  0x92   :  { %92 = vst.msk [vmem:[%s214_s2 + $0x18] sm:$0xff] %vm23_vm0, %v74_v17 }
  0x94   :  { %v80_v18 = vpop.f32.mrf.mxu2  ;;  %v86_v19 = vpop.f32.mrf.mxu3 }
  0x95   :  { %94 = vst.msk [vmem:[%s214_s2 + $0x28] sm:$0xff] %vm23_vm0, %v80_v18 }
  0x96   :  { %96 = vst.msk [vmem:[%s214_s2 + $0x38] sm:$0xff] %vm23_vm0, %v86_v19 }

</bundles_post_ra>
